<compile_context>
chip_gen: v7x
topology: tpu7x:2x2x1
jax: 0.10.0
libtpu: 0.0.40
codegen_flags: <defaults>
</compile_context>

<pallas_src>
import math

import jax
import jax.numpy as jnp
from jax.experimental import pallas as pl
from jax.experimental.pallas import tpu as pltpu


def _round_up(x, m):
    return ((x + m - 1) // m) * m


def _pick_row_tile(n, block_rows):
    """Pick (tm, padded_n).

    Prefer a 16-aligned (bf16 sublane-packed) tm that divides n exactly
    (no pad / no output slice) and yields >= 2 grid steps (v7x megacore).
    Fall back to padding when n is not 16-divisible.
    """
    if n % 16 == 0:
        top = min(block_rows, n)
        top -= top % 16
        single_step = None
        for tm in range(top, 0, -16):
            if n % tm == 0:
                if n // tm >= 2:
                    return tm, n
                if single_step is None:
                    single_step = tm
        if single_step is not None:
            return single_step, n
    tm = min(block_rows, max(16, _round_up(n, 16)))
    return tm, _round_up(n, tm)


# ----------------------------- Pallas kernel ------------------------------

def _gated_expert_kernel(x_ref, wg_ref, bg_ref, w1c_ref, b1c_ref,
                         w2s_ref, b2e_ref, o_ref):
    """Fused row-tile: gate softmax + all experts + gated combine.

    x_ref  : (tm, E)       f32 activations (cast to bf16 here)
    wg_ref : (E, NE)       bf16 gate weight (in-major)
    bg_ref : (1, NE)       f32  gate bias
    w1c_ref: (E, NE*E)     bf16 layer-1 weights, experts concatenated on out dim
    b1c_ref: (1, NE*E)     f32  layer-1 biases, concatenated to match
    w2s_ref: (NE*E, E)     bf16 layer-2 weights, experts stacked on in dim
    b2e_ref: (NE, E)       f32  layer-2 biases (combined as gate @ B2)
    o_ref  : (tm, E)       f32  output
    """
    tm, E = x_ref.shape
    NE = wg_ref.shape[1]

    x = x_ref[...].astype(jnp.bfloat16)                       # in-kernel cast

    # ---- gate: softmax(x @ Wg + bg) over experts (f32 math) ----
    logits = jnp.dot(x, wg_ref[...], preferred_element_type=jnp.float32)
    logits = logits + bg_ref[...]
    m = jnp.max(logits, axis=-1, keepdims=True)
    p = jnp.exp(logits - m)
    # approx reciprocal -> EUP slot, frees the VALU
    gate = p * pl.reciprocal(jnp.sum(p, axis=-1, keepdims=True), approx=True)

    # ---- layer 1: single (tm,E)@(E,NE*E) matmul for all experts ----
    h = jnp.dot(x, w1c_ref[...], preferred_element_type=jnp.float32)
    h = jnp.maximum(h + b1c_ref[...], 0.0)

    # ---- fold gate into h (one broadcast over the whole hidden tile) ----
    h = (h.reshape(tm, NE, E) * gate[:, :, None]).reshape(tm, NE * E)

    # ---- layer 2: (tm,NE*E)@(NE*E,E); MXU accumulation sums over experts ----
    out = jnp.dot(h.astype(jnp.bfloat16), w2s_ref[...],
                  preferred_element_type=jnp.float32)
    # gate-weighted second-layer bias: sum_e gate_e * b2_e
    out = out + jnp.dot(gate, b2e_ref[...], preferred_element_type=jnp.float32)
    o_ref[...] = out


# ------------------------------- wrapper -----------------------------------

def gated_expert_forward(params, x, *, block_rows=512):
    """x: (B, S, E) float32.  Returns (B, S, E) float32 (== PyTorch output)."""
    B, S, E = x.shape
    NE = params["num_experts"]
    N = B * S

    tm, Np = _pick_row_tile(N, block_rows)

    xf = x.reshape(N, E)                     # metadata-only reshape; stays f32
    if Np != N:                              # fallback only (N not 16-aligned)
        xf = jnp.pad(xf, ((0, Np - N), (0, 0)))

    # One-time fused weight layouts (tiny; in production do this at init).
    w1c = jnp.transpose(params["w1"], (1, 0, 2)).reshape(E, NE * E)
    w1c = w1c.astype(jnp.bfloat16)                                  # (E, NE*E)
    b1c = params["b1"].reshape(1, NE * E).astype(jnp.float32)       # (1, NE*E)
    w2s = params["w2"].reshape(NE * E, E).astype(jnp.bfloat16)      # (NE*E, E)
    b2e = params["b2"].astype(jnp.float32)                          # (NE, E)
    wg = params["gate_w"].astype(jnp.bfloat16)                      # (E, NE)
    bg = params["gate_b"].reshape(1, NE).astype(jnp.float32)        # (1, NE)

    row_spec = pl.BlockSpec((tm, E), lambda i: (i, 0))

    def full(shape):  # whole-array (weight) block, constant index
        return pl.BlockSpec(shape, lambda i: (0,) * len(shape))

    out = pl.pallas_call(
        _gated_expert_kernel,
        out_shape=jax.ShapeDtypeStruct((Np, E), jnp.float32),
        grid=(Np // tm,),
        in_specs=[row_spec,
                  full((E, NE)), full((1, NE)),
                  full((E, NE * E)), full((1, NE * E)),
                  full((NE * E, E)), full((NE, E))],
        out_specs=pl.BlockSpec((tm, E), lambda i: (i, 0)),
        compiler_params=pltpu.CompilerParams(
            dimension_semantics=("parallel",)),
    )(xf, wg, bg, w1c, b1c, w2s, b2e)

    if Np != N:
        out = out[:N]
    return out.reshape(B, S, E)


# ------------------------------ params / ref --------------------------------

def init_params(key, embed_size, num_experts=2):
    """PyTorch nn.Linear default init; weights stored pre-transposed to
    (Din, Dout) and stacked per expert."""
    E, NE = embed_size, num_experts
    keys = jax.random.split(key, 4 * NE + 2)
    ki = iter(keys)
    bound = 1.0 / math.sqrt(E)

    def uni(k, shape, b):
        return jax.random.uniform(k, shape, jnp.float32, -b, b)

    w1 = jnp.stack([uni(next(ki), (E, E), bound) for _ in range(NE)])
    b1 = jnp.stack([uni(next(ki), (E,), bound) for _ in range(NE)])
    w2 = jnp.stack([uni(next(ki), (E, E), bound) for _ in range(NE)])
    b2 = jnp.stack([uni(next(ki), (E,), bound) for _ in range(NE)])
    gate_w = uni(next(ki), (E, NE), bound)
    gate_b = uni(next(ki), (NE,), bound)
    return dict(num_experts=NE, embed_size=E,
                w1=w1, b1=b1, w2=w2, b2=b2, gate_w=gate_w, gate_b=gate_b)


def reference_forward(params, x):
    """Pure-JAX f32 reference (mirrors the PyTorch module; the two transposes
    cancel so we operate on (B, S, E) directly)."""
    NE = params["num_experts"]
    gate = jax.nn.softmax(
        jnp.einsum('bse,en->bsn', x, params["gate_w"]) + params["gate_b"],
        axis=-1)
    outs = []
    for e in range(NE):
        h = jnp.maximum(
            jnp.einsum('bse,ef->bsf', x, params["w1"][e]) + params["b1"][e],
            0.0)
        outs.append(
            jnp.einsum('bsf,fe->bse', h, params["w2"][e]) + params["b2"][e])
    expert_outputs = jnp.stack(outs, axis=-1)                 # (B, S, E, NE)
    return jnp.einsum('bsen,bsn->bse', expert_outputs, gate)


# --------------------------------- main -------------------------------------

if __name__ == "__main__":
    embed_size, num_experts = 128, 2
    B, S = 4, 16

    key = jax.random.PRNGKey(0)
    pkey, xkey = jax.random.split(key)
    params = init_params(pkey, embed_size, num_experts)
    x = jax.random.normal(xkey, (B, S, embed_size), jnp.float32)

    out = gated_expert_forward(params, x)
    out = jax.block_until_ready(out)

    assert out.shape == (B, S, embed_size), out.shape
    assert bool(jnp.isfinite(out).all())

    # bf16 matmuls + approx softmax reciprocal -> compare vs f32 reference
    # with a mixed-precision tolerance.
    ref = reference_forward(params, x)
    err = float(jnp.max(jnp.abs(out - ref)))
    assert err < 5e-2, f"max abs error {err}"

    print("KERNEL_OK")
</pallas_src>

<mosaic_0001>
module attributes {stable_mosaic.version = 11 : i64} {
  func.func @_gated_expert_kernel(%arg0: i32, %arg1: memref<32x128xf32, #tpu.memory_space<vmem>>, %arg2: memref<128x2xbf16, #tpu.memory_space<vmem>>, %arg3: memref<1x2xf32, #tpu.memory_space<vmem>>, %arg4: memref<128x256xbf16, #tpu.memory_space<vmem>>, %arg5: memref<1x256xf32, #tpu.memory_space<vmem>>, %arg6: memref<256x128xbf16, #tpu.memory_space<vmem>>, %arg7: memref<2x128xf32, #tpu.memory_space<vmem>>, %arg8: memref<32x128xf32, #tpu.memory_space<vmem>>) attributes {dimension_semantics = [#tpu.dimension_semantics<parallel>], iteration_bounds = array<i64: 2>, scalar_prefetch = 0 : i64, scratch_operands = 0 : i64, tpu.core_type = #tpu.core_type<tc>, window_params = [{transform_indices = @transform_0, window_bounds = array<i64: 32, 128>}, {pipeline_mode = #tpu.pipeline_mode<synchronous>, transform_indices = @transform_1, window_bounds = array<i64: 128, 2>}, {pipeline_mode = #tpu.pipeline_mode<synchronous>, transform_indices = @transform_2, window_bounds = array<i64: 1, 2>}, {pipeline_mode = #tpu.pipeline_mode<synchronous>, transform_indices = @transform_3, window_bounds = array<i64: 128, 256>}, {pipeline_mode = #tpu.pipeline_mode<synchronous>, transform_indices = @transform_4, window_bounds = array<i64: 1, 256>}, {pipeline_mode = #tpu.pipeline_mode<synchronous>, transform_indices = @transform_5, window_bounds = array<i64: 256, 128>}, {pipeline_mode = #tpu.pipeline_mode<synchronous>, transform_indices = @transform_6, window_bounds = array<i64: 2, 128>}, {transform_indices = @transform_7, window_bounds = array<i64: 32, 128>}]} {
    %c0 = arith.constant 0 : index
    %c0_0 = arith.constant 0 : index
    %0 = vector.load %arg1[%c0, %c0_0] : memref<32x128xf32, #tpu.memory_space<vmem>>, vector<32x128xf32>
    %1 = arith.truncf %0 : vector<32x128xf32> to vector<32x128xbf16>
    %c0_1 = arith.constant 0 : index
    %c0_2 = arith.constant 0 : index
    %2 = vector.load %arg2[%c0_1, %c0_2] : memref<128x2xbf16, #tpu.memory_space<vmem>>, vector<128x2xbf16>
    %cst = arith.constant dense<0.000000e+00> : vector<32x2xf32>
    %3 = tpu.matmul %1, %2, %cst {dimension_numbers = #tpu.dot_dimension_numbers<[1], [0], [0], [1], [0, 0, 1, 1], [], []>} : vector<32x128xbf16>, vector<128x2xbf16>, vector<32x2xf32> -> vector<32x2xf32>
    %c0_3 = arith.constant 0 : index
    %c0_4 = arith.constant 0 : index
    %4 = vector.load %arg3[%c0_3, %c0_4] : memref<1x2xf32, #tpu.memory_space<vmem>>, vector<1x2xf32>
    %5 = vector.broadcast %4 : vector<1x2xf32> to vector<32x2xf32>
    %6 = arith.addf %3, %5 : vector<32x2xf32>
    %cst_5 = arith.constant dense<0xFF800000> : vector<32xf32>
    %7 = vector.multi_reduction <maximumf>, %6, %cst_5 [1] : vector<32x2xf32> to vector<32xf32>
    %8 = vector.shape_cast %7 : vector<32xf32> to vector<32x1xf32>
    %9 = vector.broadcast %8 : vector<32x1xf32> to vector<32x2xf32>
    %10 = arith.subf %6, %9 : vector<32x2xf32>
    %11 = math.exp %10 : vector<32x2xf32>
    %cst_6 = arith.constant dense<0.000000e+00> : vector<32xf32>
    %12 = vector.multi_reduction <add>, %11, %cst_6 [1] : vector<32x2xf32> to vector<32xf32>
    %13 = vector.shape_cast %12 : vector<32xf32> to vector<32x1xf32>
    %14 = tpu.reciprocal %13 {approx = true} : vector<32x1xf32> -> vector<32x1xf32>
    %15 = vector.broadcast %14 : vector<32x1xf32> to vector<32x2xf32>
    %16 = arith.mulf %11, %15 : vector<32x2xf32>
    %c0_7 = arith.constant 0 : index
    %c0_8 = arith.constant 0 : index
    %17 = vector.load %arg4[%c0_7, %c0_8] : memref<128x256xbf16, #tpu.memory_space<vmem>>, vector<128x256xbf16>
    %cst_9 = arith.constant dense<0.000000e+00> : vector<32x256xf32>
    %18 = tpu.matmul %1, %17, %cst_9 {dimension_numbers = #tpu.dot_dimension_numbers<[1], [0], [0], [1], [0, 0, 1, 1], [], []>} : vector<32x128xbf16>, vector<128x256xbf16>, vector<32x256xf32> -> vector<32x256xf32>
    %c0_10 = arith.constant 0 : index
    %c0_11 = arith.constant 0 : index
    %19 = vector.load %arg5[%c0_10, %c0_11] : memref<1x256xf32, #tpu.memory_space<vmem>>, vector<1x256xf32>
    %20 = vector.broadcast %19 : vector<1x256xf32> to vector<32x256xf32>
    %21 = arith.addf %18, %20 : vector<32x256xf32>
    %cst_12 = arith.constant 0.000000e+00 : f32
    %22 = vector.broadcast %cst_12 : f32 to vector<32x256xf32>
    %23 = arith.maximumf %21, %22 : vector<32x256xf32>
    %24 = vector.shape_cast %23 : vector<32x256xf32> to vector<32x2x128xf32>
    %25 = vector.shape_cast %16 : vector<32x2xf32> to vector<32x2x1xf32>
    %26 = vector.broadcast %25 : vector<32x2x1xf32> to vector<32x2x128xf32>
    %27 = arith.mulf %24, %26 : vector<32x2x128xf32>
    %28 = vector.shape_cast %27 : vector<32x2x128xf32> to vector<32x256xf32>
    %29 = arith.truncf %28 : vector<32x256xf32> to vector<32x256xbf16>
    %c0_13 = arith.constant 0 : index
    %c0_14 = arith.constant 0 : index
    %30 = vector.load %arg6[%c0_13, %c0_14] : memref<256x128xbf16, #tpu.memory_space<vmem>>, vector<256x128xbf16>
    %cst_15 = arith.constant dense<0.000000e+00> : vector<32x128xf32>
    %31 = tpu.matmul %29, %30, %cst_15 {dimension_numbers = #tpu.dot_dimension_numbers<[1], [0], [0], [1], [0, 0, 1, 1], [], []>} : vector<32x256xbf16>, vector<256x128xbf16>, vector<32x128xf32> -> vector<32x128xf32>
    %c0_16 = arith.constant 0 : index
    %c0_17 = arith.constant 0 : index
    %32 = vector.load %arg7[%c0_16, %c0_17] : memref<2x128xf32, #tpu.memory_space<vmem>>, vector<2x128xf32>
    %cst_18 = arith.constant dense<0.000000e+00> : vector<32x128xf32>
    %33 = tpu.matmul %16, %32, %cst_18 {dimension_numbers = #tpu.dot_dimension_numbers<[1], [0], [0], [1], [0, 0, 1, 1], [], []>} : vector<32x2xf32>, vector<2x128xf32>, vector<32x128xf32> -> vector<32x128xf32>
    %34 = arith.addf %31, %33 : vector<32x128xf32>
    %c0_19 = arith.constant 0 : index
    %c0_20 = arith.constant 0 : index
    %35 = vector.load %arg8[%c0_19, %c0_20] : memref<32x128xf32, #tpu.memory_space<vmem>>, vector<32x128xf32>
    tpu.vector_store %arg8[%c0_19, %c0_20], %34 {strides = array<i32>} : memref<32x128xf32, #tpu.memory_space<vmem>>, vector<32x128xf32>,
    return
  }
  func.func @transform_0(%arg0: i32) -> (i32, i32) {
    %c0_i32 = arith.constant 0 : i32
    %c0_i32_0 = arith.constant 0 : i32
    return %arg0, %c0_i32 : i32, i32
  }
  func.func @transform_1(%arg0: i32) -> (i32, i32) {
    %c0_i32 = arith.constant 0 : i32
    %c0_i32_0 = arith.constant 0 : i32
    %c0_i32_1 = arith.constant 0 : i32
    return %c0_i32, %c0_i32_0 : i32, i32
  }
  func.func @transform_2(%arg0: i32) -> (i32, i32) {
    %c0_i32 = arith.constant 0 : i32
    %c0_i32_0 = arith.constant 0 : i32
    %c0_i32_1 = arith.constant 0 : i32
    return %c0_i32, %c0_i32_0 : i32, i32
  }
  func.func @transform_3(%arg0: i32) -> (i32, i32) {
    %c0_i32 = arith.constant 0 : i32
    %c0_i32_0 = arith.constant 0 : i32
    %c0_i32_1 = arith.constant 0 : i32
    return %c0_i32, %c0_i32_0 : i32, i32
  }
  func.func @transform_4(%arg0: i32) -> (i32, i32) {
    %c0_i32 = arith.constant 0 : i32
    %c0_i32_0 = arith.constant 0 : i32
    %c0_i32_1 = arith.constant 0 : i32
    return %c0_i32, %c0_i32_0 : i32, i32
  }
  func.func @transform_5(%arg0: i32) -> (i32, i32) {
    %c0_i32 = arith.constant 0 : i32
    %c0_i32_0 = arith.constant 0 : i32
    %c0_i32_1 = arith.constant 0 : i32
    return %c0_i32, %c0_i32_0 : i32, i32
  }
  func.func @transform_6(%arg0: i32) -> (i32, i32) {
    %c0_i32 = arith.constant 0 : i32
    %c0_i32_0 = arith.constant 0 : i32
    %c0_i32_1 = arith.constant 0 : i32
    return %c0_i32, %c0_i32_0 : i32, i32
  }
  func.func @transform_7(%arg0: i32) -> (i32, i32) {
    %c0_i32 = arith.constant 0 : i32
    %c0_i32_0 = arith.constant 0 : i32
    return %arg0, %c0_i32 : i32, i32
  }
}

</mosaic_0001>

<bundles_post_ra>
// kernel: tpu_custom_call.1
= control target key start
LH: loop header
LB: loop body
LE: loop exit
PB: predicated region body
PF: predicated region fallthrough
CT: control target
= control target key end

     0   :  { %12 = vsyncpa [#allocation3], 0  ;;  %s2757_s0 = inlined_call_operand.vmem [shape: f32[64,128], index: 0, kind: input, shape index: {}]   ;;  %s2758_s1 = inlined_call_operand.vmem [shape: bf16[128,2], index: 1, kind: input, shape index: {}]   ;;  %s2759_s2 = inlined_call_operand.vmem [shape: f32[1,2], index: 2, kind: input, shape index: {}]   ;;  %s2760_s3 = inlined_call_operand.hbm [shape: bf16[128,256], index: 3, kind: input, shape index: {}]   ;;  %s2761_s4 = inlined_call_operand.vmem [shape: f32[1,256], index: 4, kind: input, shape index: {}]   ;;  %s2762_s5 = inlined_call_operand.hbm [shape: bf16[256,128], index: 5, kind: input, shape index: {}]   ;;  %s2763_s6 = inlined_call_operand.vmem [shape: f32[2,128], index: 6, kind: input, shape index: {}]   ;;  %s2764_s7 = inlined_call_operand.hbm [shape: f32[64,128], index: 7, kind: output, shape index: {}]  }
   0x1   :  { %13 = vsyncpa [#allocation6], 0 }
   0x2   :  { %14 = vsyncpa [#allocation4], 0 }
   0x3   :  { %16 = vsyncpa [#allocation4 + $0x1], 0  ;;  %s2205_s24 = smov 0   ;;  %s2207_s25 = smov 0  }
   0x4   :  { %s2209_s26 = smov 0   ;;  %s2211_s27 = smov 0  }
   0x5 LB: > { %s2226_s28 = sadd.s32 4294967295, %s2150_s27   ;;  %s1756_s29 = sadd.s32 4294967294, %s2150_s27   ;;  %s2150_s27 = sphi %s2211_s27, %s2784_s27   ;;  %s2146_s26 = sphi %s2209_s26, %s2783_s26   ;;  %s2142_s25 = sphi %s2207_s25, %s2782_s25   ;;  %s2138_s24 = sphi %s2205_s24, %s2781_s24  }
   0x6   : > { %s2230_s30 = sadd.s32 1, %s2150_s27   ;;  %s181_s8 = sadd.s32 1, %s2146_s26 }
   0x7   : > { %s178_s9 = ssub.s32 %s2150_s27, %s2230_s30  ;;  %p191_p0 = scmp.ne.s32.totalorder %s2146_s26, %s2142_s25 }
   0x8   : > { %p179_p1 = scmp.eq.s32.totalorder %s178_s9, 0  ;;  %p192_p2 = scmp.eq.s32.totalorder %s2226_s28, 1 }
   0x9   : > { %p197_p3 = scmp.ne.s32.totalorder %s2142_s25, %s2138_s24  ;;  %p198_p4 = scmp.eq.s32.totalorder %s1756_s29, 1 }
   0xa   : > { %s2241_s10 = scalar_select %p179_p1, %s2146_s26, %s181_s8  }
   0xb   : > { %p2243_p5 = por %p192_p2, %p191_p0  ;;  %p2247_p6 = por %p198_p4, %p197_p3 }
   0xc   : > { %2768 = sst [smem:[#allocation11_spill]] %s2241_s10  ;;  %p1757_p7 = scmp.ge.s32.totalorder %s2150_s27, 1 }
   0xd   : > { %s2769_s11 = scalar_select %p2243_p5, 1, 0 }
   0xe   : > { %s2770_s12 = scalar_select %p2247_p6, 1, 0 }
   0xf   : > { %p205_p8 = scmp.lt.s32.totalorder %s2150_s27, 3  ;;  %p2765_p9 = scmp.eq.s32.totalorder %s2226_s28, 0 }
  0x10   : > { %s2152_s14 = smov [#allocation2]   ;;  %s2153_s17 = smov [#allocation5]  }
  0x11   : > { %p2254_p10 = pnand %p1757_p7, %p205_p8  ;;  %s223_s15 = sshll.u32 %s2152_s14, 4  ;;  %s224_s15 = int_to_ptr.vmem [resolvable:$true] %s223_s15 }
  0x12   : > { %s239_s18 = sshll.u32 %s2153_s17, 4  ;;  %s2024_s21 = scalar_lea.hbm %s2760_s3, 2048  ;;  %s2266_s18 = int_to_ptr.vmem [resolvable:$true] %s239_s18 }
  0x13   : > { %s2771_s13 = scalar_select %p2254_p10, 1, 0 }
  0x14   : > { %p1900_p11 = pneg %p2254_p10  ;;  %p2025_p13 = scmp.ne.s32.totalorder %s2760_s3, %s2024_s21 }
  0x15   : > { %p2031_p3 = scmp.lt.u32.totalorder %s2024_s21, %s2760_s3 }
  0x16   : > { %p2262_p12 = pnand %p2765_p9, %p1900_p11 }
  0x18   : > { %p2026_p0 = pneg %p2262_p12 }
  0x1a   : > { %p2027_p1 = pnand %p2026_p0, %p2025_p13 }
  0x1c   : > { %p2028_p2 = pneg %p2027_p1 }
  0x1e   : > { %p2033_p4 = pnand %p2031_p3, %p2028_p2 }
  0x20   : > { %2036 = shalt.err (!%p2033_p4)
}
  0x21   : > { %s2037_s9 = scalar_lea.vmem %s224_s15, 2048  ;;  %p2045_p9 = scmp.lt.s32.totalorder %s224_s15, %s224_s15 }
  0x22   : > { %p2038_p7 = scmp.ne.s32.totalorder %s224_s15, %s2037_s9  ;;  %p2046_p6 = scmp.lt.s32.totalorder %s2037_s9, %s2037_s9 }
  0x24   : > { %p2040_p8 = pnand %p2038_p7, %p2026_p0  ;;  %p2047_p5 = por %p2046_p6, %p2045_p9 }
  0x26   : > { %p2041_p11 = pneg %p2040_p8 }
  0x28   : > { %p2048_p10 = pnand %p2047_p5, %p2041_p11 }
  0x2a   : > { %2051 = shalt.err (!%p2048_p10)
}
  0x2b   : > { %s2154_s14 = smov 128   ;;  %s2155_s17 = smov 8  }
  0x2c   : > { %1903 = dma.hbm_to_vmem [thread:$0]  (!%p2262_p12), %s2760_s3, 2048, %s224_s15, [#allocation3], %s2154_s14, %s2154_s14, %s2155_s17  }
  0x2d   : > { %s2052_s23 = scalar_lea.hbm %s2762_s5, 2048 }
  0x2e   : > { %p2053_p13 = scmp.ne.s32.totalorder %s2762_s5, %s2052_s23  ;;  %p2059_p9 = scmp.lt.u32.totalorder %s2052_s23, %s2762_s5 }
  0x30   : > { %p2055_p5 = pnand %p2053_p13, %p2026_p0 }
  0x32   : > { %p2056_p6 = pneg %p2055_p5 }
  0x34   : > { %p2061_p10 = pnand %p2059_p9, %p2056_p6 }
  0x36   : > { %2064 = shalt.err (!%p2061_p10)
}
  0x37   : > { %s2065_s15 = scalar_lea.vmem %s2266_s18, 2048  ;;  %p2073_p4 = scmp.lt.s32.totalorder %s2266_s18, %s2266_s18 }
  0x38   : > { %p2066_p1 = scmp.ne.s32.totalorder %s2266_s18, %s2065_s15  ;;  %p2074_p7 = scmp.lt.s32.totalorder %s2065_s15, %s2065_s15 }
  0x3a   : > { %p2068_p2 = pnand %p2066_p1, %p2026_p0  ;;  %p2075_p8 = por %p2074_p7, %p2073_p4 }
  0x3c   : > { %p2069_p3 = pneg %p2068_p2 }
  0x3e   : > { %p2076_p11 = pnand %p2075_p8, %p2069_p3 }
  0x40   : > { %2079 = shalt.err (!%p2076_p11)
}
  0x41   : > { %s2156_s10 = smov 64   ;;  %s2157_s14 = smov 4  }
  0x42   : > { %1906 = dma.hbm_to_vmem [thread:$0]  (!%p2262_p12), %s2762_s5, 2048, %s2266_s18, [#allocation6], %s2156_s10, %s2156_s10, %s2157_s14  }
  0x43   : > { %p2773_p13 = scmp.ne.s32.totalorder %s2771_s13, 0 }
  0x44   : > { %p2774_p0 = scmp.eq.s32.totalorder (!%p2773_p13), %s2226_s28, 0 }
  0x45   : > { %267 = sbr.rel (%p2773_p13) target bundleno = 1076 (0x434), region = 48 }
  0x4c   : > { %2125 = dma.done.wait (%p2774_p0), [#allocation3], 2048   ;;  %p2775_p5 = pmov %p2774_p0 }
  0x4d   : > { %p2776_p6 = pmov %p2774_p0 }
  0x4e   : > { %2127 = vsyncadd (%p2775_p5), [#allocation3], 4294965248 }
  0x4f   : > { %2129 = dma.done.wait (%p2776_p6), [#allocation6], 2048   ;;  %p2777_p9 = pmov %p2774_p0 }
  0x50   : > { %s1765_s16 = sshll.u32 %s2226_s28, 2  ;;  %v1960_v0 = vld [vmem:[%s2758_s1] sm:$0xff]   ;;  %v1961_v1 = vld [vmem:[%s2758_s1 + $0x8] sm:$0xff]   ;;  %v1962_v2 = vld [vmem:[%s2758_s1 + $0x10] sm:$0xff]   ;;  %vm437_vm0 = vcmask 15360   ;;  %v2158_v32 = vmov 0  }
  0x51   : > { %2131 = vsyncadd (%p2777_p9), [#allocation6], 4294965248  ;;  %p304_p10 = scmp.lt.s32.totalorder %s1765_s16, 7  ;;  %1862 = vmatprep.subr.bf16.mxu0 %v1960_v0  ;;  %v1963_v3 = vld [vmem:[%s2758_s1 + $0x18] sm:$0xff]   ;;  %v1964_v7 = vld [vmem:[%s2758_s1 + $0x20] sm:$0xff]   ;;  %622 = vmatprep.mubr.bf16.mxu1 %v2158_v32  ;;  %vm1420_vm1 = vcmask 1041408  }
  0x52   : > { %1863 = vmatpush3.bf16.msra.mxu0 %v1960_v0  ;;  %v1965_v8 = vld [vmem:[%s2758_s1 + $0x28] sm:$0xff]   ;;  %v1966_v9 = vld [vmem:[%s2758_s1 + $0x30] sm:$0xff]   ;;  %v1967_v10 = vld [vmem:[%s2758_s1 + $0x38] sm:$0xff]   ;;  %s300_s14 = sand.u32 1, %s2142_s25   ;;  %s1818_s18 = sshll.u32 %s2226_s28, 9 }
  0x53   : > { %s2786_s16 = smov (!%p304_p10, %s1765_s16), 7  ;;  %1864 = vmatprep.subr.bf16.mxu0 %v1961_v1  ;;  %v1767_v14 = vld [vmem:[%s2759_s2] ss:$0 sm:$0xff]  ;;  %v1968_v27 = vld [vmem:[#allocation2 + $0x4] ss:$8 sps:$4 sm:$0xff]   ;;  %s1764_s17 = sshll.u32 %s300_s14, 5 }
  0x54   : > { %s1766_s22 = sshll.u32 %s2786_s16, 3  ;;  %v1970_v28 = vld [vmem:[#allocation2] ss:$8 sps:$4 sm:$0xff]   ;;  %v1971_v29 = vld [vmem:[#allocation2 + $0x14] ss:$8 sps:$4 sm:$0xff]   ;;  %590 = vmatprep.subr.bf16.mxu1 %v1968_v27  ;;  %s302_s19 = scalar_lea.vmem [#allocation7], %s1764_s17 }
  0x55   : > { %s307_s15 = scalar_lea.vmem %s2757_s0, %s1766_s22  ;;  %591 = vmatpush1.bf16.msra.mxu1 %v1970_v28  ;;  %v1973_v30 = vld [vmem:[#allocation2 + $0x10] ss:$8 sps:$4 sm:$0xff]   ;;  %v1974_v31 = vld [vmem:[#allocation2 + $0x24] ss:$8 sps:$4 sm:$0xff]   ;;  %v1976_v33 = vld [vmem:[#allocation2 + $0x20] ss:$8 sps:$4 sm:$0xff]   ;;  %s2714_s21 = scalar_lea.hbm %s2764_s7, %s1818_s18 }
  0x56   : > { %1865 = vmatpush3.bf16.msra.mxu0 %v1961_v1  ;;  %v311_v4 = vld [vmem:[%s307_s15] sm:$0xff]  ;;  %v312_v5 = vld [vmem:[%s307_s15 + $0x8] sm:$0xff]  ;;  %v313_v11 = vld [vmem:[%s307_s15 + $0x10] sm:$0xff]  ;;  %592 = vmatprep.subr.bf16.mxu1 %v1971_v29  ;;  %v500_v1 = vlaneseq  ;;  %s1672_s16 = sshll.u32 %s302_s19, 4  ;;  %s2716_s22 = scalar_lea.sflag [#allocation4], %s300_s14  ;;  %s2709_s16 = int_to_ptr.vmem [resolvable:$true] %s1672_s16 }
  0x57   : > { %1866 = vmatprep.subr.bf16.mxu0 %v1962_v2  ;;  %v2341_v6 = vpack.c.bf16 %v312_v5, %v311_v4  ;;  %v314_v12 = vld [vmem:[%s307_s15 + $0x18] sm:$0xff]  ;;  %v1980_v36 = vld [vmem:[#allocation2 + $0x44] ss:$8 sps:$4 sm:$0xff]   ;;  %v1982_v37 = vld [vmem:[#allocation2 + $0x40] ss:$8 sps:$4 sm:$0xff]   ;;  %s2080_s23 = scalar_lea.vmem %s2709_s16, 512 }
  0x58   : > { %v316_v13 = vpack.c.bf16 %v314_v12, %v313_v11  ;;  %v1977_v34 = vld [vmem:[#allocation2 + $0x34] ss:$8 sps:$4 sm:$0xff]   ;;  %v1979_v35 = vld [vmem:[#allocation2 + $0x30] ss:$8 sps:$4 sm:$0xff]   ;;  %v1986_v40 = vld [vmem:[#allocation2 + $0x64] ss:$8 sps:$4 sm:$0xff]   ;;  %p2081_p12 = scmp.ne.s32.totalorder %s2709_s16, %s2080_s23 }
  0x59   : > { %1878 = vmatprep.mubr.bf16.mxu0 %v2341_v6  ;;  %593 = vmatpush1.bf16.msra.mxu1 %v1973_v30  ;;  %v1983_v38 = vld [vmem:[#allocation2 + $0x54] ss:$8 sps:$4 sm:$0xff]   ;;  %v1985_v39 = vld [vmem:[#allocation2 + $0x50] ss:$8 sps:$4 sm:$0xff]   ;;  %v1988_v41 = vld [vmem:[#allocation2 + $0x60] ss:$8 sps:$4 sm:$0xff]  }
  0x5a   : > { %1867 = vmatpush3.bf16.msra.mxu0 %v1962_v2  ;;  %594 = vmatprep.subr.bf16.mxu1 %v1974_v31  ;;  %v1989_v42 = vld [vmem:[#allocation2 + $0x74] ss:$8 sps:$4 sm:$0xff]   ;;  %v1991_v43 = vld [vmem:[#allocation2 + $0x70] ss:$8 sps:$4 sm:$0xff]   ;;  %v1407_v0 = vld [vmem:[%s2763_s6] sm:$0x3] }
  0x5b   : > { %1868 = vmatprep.subr.bf16.mxu0 %v1963_v3  ;;  %v2383_v2 = vshrl.u32 %v500_v1, 7  ;;  %v498_v5 = vld [vmem:[%s2761_s4] sm:$0x3]  ;;  %p2778_p1 = scmp.ne.s32.totalorder %s2769_s11, 0  ;;  %s2162_s28 = smov [#allocation7]  }
  0x5c   : > { %s2084_s29 = sshll.u32 %s2162_s28, 4  ;;  %s2085_s29 = int_to_ptr.vmem [resolvable:$false] %s2084_s29 }
  0x5d   : > { %595 = vmatpush1.bf16.msra.mxu1 %v1976_v33  ;;  %p2082_p2 = pnand %p2081_p12, %p2778_p1  ;;  %s2086_s8 = scalar_lea.vmem %s2085_s29, 1024 }
  0x5e   : > { %1869 = vmatpush3.bf16.msra.mxu0 %v1963_v3  ;;  %596 = vmatprep.subr.bf16.mxu1 %v1977_v34  ;;  %v2159_v3 = vmov 1983009808   ;;  %p2087_p4 = scmp.lt.s32.totalorder %s2709_s16, %s2085_s29  ;;  %p2088_p7 = scmp.lt.s32.totalorder %s2086_s8, %s2080_s23 }
  0x5f   : > { %1870 = vmatprep.subr.bf16.mxu0 %v1964_v7  ;;  %v653_v4 = vunpack.c.l.s4 %v2159_v3  ;;  %p2083_p3 = pneg %p2082_p2 }
  0x60   : > { %p2089_p8 = por %p2088_p7, %p2087_p4 }
  0x61   : > { %597 = vmatpush1.bf16.msra.mxu1 %v1979_v35 }
  0x62   : > { %1871 = vmatpush3.bf16.msra.mxu0 %v1964_v7  ;;  %598 = vmatprep.subr.bf16.mxu1 %v1980_v36  ;;  %v2392_v7 = vsub.s32 1, %v2383_v2  ;;  %p2090_p11 = pnand %p2089_p8, %p2083_p3 }
  0x63   : > { %1872 = vmatprep.subr.bf16.mxu0 %v1965_v8 }
  0x64   : > { %v2398_v11 = vrot.slane %v498_v5, %v2392_v7 }
  0x65   : > { %599 = vmatpush1.bf16.msra.mxu1 %v1982_v37 }
  0x66   : > { %1873 = vmatpush3.bf16.msra.mxu0 %v1965_v8  ;;  %600 = vmatprep.subr.bf16.mxu1 %v1983_v38  ;;  %v654_v8 = vunpack.c.0.s8 %v653_v4 }
  0x67   : > { %1874 = vmatprep.subr.bf16.mxu0 %v1966_v9 }
  0x69   : > { %601 = vmatpush1.bf16.msra.mxu1 %v1985_v39 }
  0x6a   : > { %1875 = vmatpush3.bf16.msra.mxu0 %v1966_v9  ;;  %602 = vmatprep.subr.bf16.mxu1 %v1986_v40 }
  0x6b   : > { %1876 = vmatprep.subr.bf16.mxu0 %v1967_v10 }
  0x6d   : > { %603 = vmatpush1.bf16.msra.mxu1 %v1988_v41 }
  0x6e   : > { %1877 = vmatpush3.bf16.msra.mxu0 %v1967_v10  ;;  %604 = vmatprep.subr.bf16.mxu1 %v1989_v42 }
  0x6f   : > { %1882 = vmatprep.subr.msk.mxu0 %vm1420_vm1, %v1407_v0 }
  0x71   : > { %1879 = vmatmul.mubr.bf16.vlgmr.msra.gmra.mrb[0].mxu0 %v316_v13  ;;  %605 = vmatpush1.bf16.msra.mxu1 %v1991_v43 }
  0x72   : > { %1883 = vmatpush3.msk.msra.mxu0 %vm1420_vm1, %v1407_v0 }
  0x74   : > { %623 = vmatmul.mubr.bf16.vlgmr.msra.gmra.mrb[0].mxu1 %v2341_v6  ;;  %v2389_v6 = vsub.s32 0, %v2383_v2 }
  0x75   : > { %632 = vmatprep.mubr.bf16.mxu1 %v2158_v32 }
  0x76   : > { %v2395_v9 = vrot.slane %v498_v5, %v2389_v6 }
  0x7c   : > { %633 = vmatmul.mubr.bf16.gmra.mrb[4].mxu1 %v316_v13 }
 0x144   : > { %v1880_v15 = vpop.f32.mrb[0].mxu0 }
 0x145   : > { %v431_v16 = vadd.f32 %v1880_v15, %v1767_v14  ;;  %v422_v17 = vpop.f32.mrb[1].mxu0 }
 0x146   : > { %v423_v18 = vadd.f32 %v1767_v14, %v422_v17  ;;  %v1881_v19 = vpop.f32.mrb[2].mxu0 }
 0x147   : > { %v434_v20 = vadd.f32 %v1881_v19, %v1767_v14  ;;  %v425_v21 = vpop.f32.mrb[3].mxu0  ;;  %v444_v22 = vsel %vm437_vm0, %v431_v16, -inf  ;;  %v624_v10 = vpop.f32.mrb[0].mxu1 }
 0x148   : > { %v426_v23 = vadd.f32 %v1767_v14, %v425_v21  ;;  %445 = vmax.xlane.f32.xlu1 %v444_v22  ;;  %v438_v24 = vsel %vm437_vm0, %v423_v18, -inf  ;;  %v625_v12 = vadd.f32 %v624_v10, %v2395_v9  ;;  %v626_v13 = vpop.f32.mrb[1].mxu1  ;;  %v2160_v22 = vmov 0.0  }
 0x149   : > { %439 = vmax.xlane.f32.xlu0 %v438_v24  ;;  %v447_v25 = vsel %vm437_vm0, %v434_v20, -inf  ;;  %v627_v14 = vadd.f32 %v626_v13, %v2398_v11  ;;  %v628_v15 = vpop.f32.mrb[2].mxu1 }
 0x14a   : > { %v441_v26 = vsel %vm437_vm0, %v426_v23, -inf  ;;  %v643_v17 = vmax.f32 %v625_v12, 0.0  ;;  %v630_v19 = vpop.f32.mrb[3].mxu1 }
 0x14b   : > { %v631_v21 = vadd.f32 %v630_v19, %v2398_v11 }
 0x14c   : > { %448 = vmax.xlane.f32.xlu1 %v447_v25 }
 0x14d   : > { %442 = vmax.xlane.f32.xlu0 %v441_v26  ;;  %v2161_v26 = vmov 1934713408   ;;  %v646_v30 = vmax.f32 %v631_v21, 0.0 }
 0x14e   : > { %v684_v27 = vunpack.c.l.s4 %v2161_v26 }
 0x14f   : > { %v732_v36 = vcombine.high %v646_v30, %v2160_v22  ;;  %v634_v38 = vpop.f32.mrb[4].mxu1 }
 0x150   : > { %v635_v40 = vadd.f32 %v634_v38, %v2395_v9  ;;  %v636_v41 = vpop.f32.mrb[5].mxu1  ;;  %v685_v42 = vunpack.c.0.s8 %v684_v27 }
 0x151   : > { %v638_v27 = vpop.f32.mrb[6].mxu1 }
 0x152   : > { %v640_v38 = vpop.f32.mrb[7].mxu1 }
 0x1d5   : > { %v446_v44 = vpop.xlane.xlu1 %445 }
 0x1d6   : > { %v452_v45 = vsub.f32 %v431_v16, %v446_v44  ;;  %v440_v46 = vpop.xlane.xlu0 %439  ;;  %v2403_v16 = vsub.s32 %v654_v8, %v2383_v2  ;;  %v637_v44 = vadd.f32 %v636_v41, %v2398_v11 }
 0x1d7   : > { %v450_v47 = vsub.f32 %v423_v18, %v440_v46  ;;  %v629_v18 = vadd.f32 %v628_v15, %v2395_v9 }
 0x1d8   : > { %v458_v48 = vmul.f32 1.442695, %v452_v45  ;;  %v2409_v24 = vrot.slane %v643_v17, %v2403_v16  ;;  %v2429_v37 = vrot.slane %v646_v30, %v2403_v16  ;;  %v2436_v43 = vrot.slane %v732_v36, %v2403_v16 }
 0x1d9   : > { %v454_v49 = vmul.f32 1.442695, %v450_v47  ;;  %v449_v50 = vpop.xlane.xlu1 %448  ;;  %v645_v25 = vmax.f32 %v629_v18, 0.0  ;;  %v647_v45 = vmax.f32 %v635_v40, 0.0  ;;  %v648_v46 = vmax.f32 %v637_v44, 0.0 }
 0x1da   : > { %v453_v51 = vsub.f32 %v434_v20, %v449_v50  ;;  %v443_v52 = vpop.xlane.xlu0 %442  ;;  %v644_v20 = vmax.f32 %v627_v14, 0.0  ;;  %v2469_v18 = vsub.s32 2, %v2383_v2  ;;  %v639_v36 = vadd.f32 %v638_v27, %v2395_v9  ;;  %v1993_v27 = vld [vmem:[#allocation5] sm:$0xff]  }
 0x1db   : > { %2008 = vpow2.f32 %v454_v49  ;;  %v451_v53 = vsub.f32 %v426_v23, %v443_v52  ;;  %v651_v23 = vcombine.high %v643_v17, %v2160_v22  ;;  %v717_v32 = vcombine.high %v645_v25, %v2160_v22 }
 0x1dc   : > { %v460_v54 = vmul.f32 1.442695, %v453_v51  ;;  %2010 = vpow2.f32 %v458_v48  ;;  %v666_v28 = vcombine.high %v644_v20, %v2160_v22  ;;  %v2413_v29 = vrot.slane %v644_v20, %v2403_v16 }
 0x1dd   : > { %v456_v55 = vmul.f32 1.442695, %v451_v53  ;;  %v2416_v31 = vrot.slane %v651_v23, %v2403_v16  ;;  %v2420_v33 = vrot.slane %v645_v25, %v2403_v16  ;;  %v2432_v39 = vrot.slane %v717_v32, %v2403_v16 }
 0x1de   : > { %2012 = vpow2.f32 %v460_v54  ;;  %v2423_v34 = vrot.slane %v666_v28, %v2403_v16  ;;  %v681_v35 = vcombine.low %v2409_v24, %v2413_v29  ;;  %v783_v47 = vcombine.high %v647_v45, %v2160_v22 }
 0x1df   : > { %2014 = vpow2.f32 %v456_v55  ;;  %v790_v48 = vrot.slane %v647_v45, %v2403_v16  ;;  %v2442_v49 = vsub.s32 %v685_v42, %v2383_v2  ;;  %v798_v50 = vcombine.high %v648_v46, %v2160_v22 }
 0x1e0   : > { %v805_v51 = vrot.slane %v648_v46, %v2403_v16  ;;  %v797_v52 = vrot.slane %v783_v47, %v2403_v16  ;;  %v2483_v23 = vsub.s32 5, %v2383_v2  ;;  %v2486_v25 = vsub.s32 4, %v2383_v2 }
 0x1e1   : > { %v812_v53 = vrot.slane %v798_v50, %v2403_v16  ;;  %v682_v28 = vcombine.high %v2409_v24, %v2413_v29  ;;  %v641_v40 = vadd.f32 %v640_v38, %v2398_v11  ;;  %v2509_v42 = vsub.s32 6, %v2383_v2 }
 0x1e2   : > { %v813_v54 = vcombine.low %v790_v48, %v805_v51  ;;  %v814_v55 = vcombine.high %v790_v48, %v805_v51  ;;  %v649_v24 = vmax.f32 %v639_v36, 0.0  ;;  %v697_v44 = vcombine.low %v2416_v31, %v2423_v34 }
 0x1e3   : > { %v829_v10 = vcombine.low %v797_v52, %v812_v53  ;;  %v830_v21 = vcombine.high %v797_v52, %v812_v53  ;;  %v2503_v41 = vrot.slane %v682_v28, %v2442_v49  ;;  %v650_v29 = vmax.f32 %v641_v40, 0.0  ;;  %v1994_v28 = vld [vmem:[#allocation5 + $0x48] sm:$0xff]  }
 0x1e4   : > { %v2452_v1 = vrot.slane %v814_v55, %v2442_v49  ;;  %v849_v45 = vcombine.high %v649_v24, %v2160_v22  ;;  %v856_v46 = vrot.slane %v649_v24, %v2403_v16  ;;  %v698_v52 = vcombine.high %v2416_v31, %v2423_v34 }
 0x1e5   : > { %v2364_v56 = vpop.eup %2008  ;;  %v2480_v20 = vrot.slane %v829_v10, %v2442_v49  ;;  %v2491_v26 = vrot.slane %v830_v21, %v2442_v49  ;;  %v864_v47 = vcombine.high %v650_v29, %v2160_v22  ;;  %v871_v48 = vrot.slane %v650_v29, %v2403_v16  ;;  %v1992_v10 = vld [vmem:[#allocation5 + $0x40] sm:$0xff]   ;;  %v1997_v29 = vld [vmem:[#allocation5 + $0x10] sm:$0xff]  }
 0x1e6   : > { %v462_v57 = vsel %vm437_vm0, %v2364_v56, 0.0  ;;  %v2368_v58 = vpop.eup %2010  ;;  %v2523_v50 = vrot.slane %v849_v45, %v2403_v16  ;;  %v2535_v55 = vrot.slane %v698_v52, %v2442_v49  ;;  %1834 = vmatprep.subr.bf16.mxu1 %v1992_v10  ;;  %v764_v38 = vcombine.high %v2432_v39, %v2436_v43  ;;  %v2001_v52 = vld [vmem:[#allocation5 + $0x20] sm:$0xff]  }
 0x1e7   : > { %463 = vadd.xlane.f32.xlu0 %v462_v57  ;;  %v468_v62 = vsel %vm437_vm0, %v2368_v58, 0.0  ;;  %v2526_v51 = vrot.slane %v864_v47, %v2403_v16  ;;  %v880_v34 = vcombine.high %v856_v46, %v871_v48  ;;  %1835 = vmatpush3.bf16.msra.mxu1 %v1993_v27 }
 0x1e8   : > { %v2370_v59 = vpop.eup %2012  ;;  %1836 = vmatprep.subr.bf16.mxu1 %v1994_v28 }
 0x1e9   : > { %v471_v60 = vsel %vm437_vm0, %v2370_v59, 0.0  ;;  %v2374_v61 = vpop.eup %2014 }
 0x1ea   : > { %472 = vadd.xlane.f32.xlu1 %v471_v60  ;;  %v465_v63 = vsel %vm437_vm0, %v2374_v61, 0.0  ;;  %v2449_v60 = vrot.slane %v813_v54, %v2442_v49 }
 0x1eb   : > { %469 = vadd.xlane.f32.xlu0 %v468_v62 }
 0x1ee   : > { %466 = vadd.xlane.f32.xlu1 %v465_v63 }
 0x274   : > { %v464_v57 = vpop.xlane.xlu0 %463 }
 0x275   : > { %2016 = vrcp.f32 %v464_v57  ;;  %v879_v57 = vcombine.low %v856_v46, %v871_v48  ;;  %v896_v46 = vcombine.high %v2523_v50, %v2526_v51 }
 0x277   : > { %v473_v62 = vpop.xlane.xlu1 %472  ;;  %v2542_v31 = vrot.slane %v879_v57, %v2442_v49  ;;  %v2603_v48 = vrot.slane %v896_v46, %v2442_v49 }
 0x278   : > { %v470_v63 = vpop.xlane.xlu0 %469 }
 0x279   : > { %2018 = vrcp.f32 %v470_v63 }
 0x27b   : > { %v467_v0 = vpop.xlane.xlu1 %466 }
 0x27c   : > { %2020 = vrcp.f32 %v467_v0 }
 0x27d   : > { %2022 = vrcp.f32 %v473_v62 }
 0x27f   : > { %v2017_v3 = vpop.eup %2016 }
 0x280   : > { %v2455_v4 = vmul.f32 %v2017_v3, %v2364_v56  ;;  %v2466_v56 = vsub.s32 3, %v2383_v2 }
 0x282   : > { %1884 = vmatprep.mubr.msk.f32.mxu0 %vm437_vm0, %v2455_v4  ;;  %v925_v53 = vrot.slane %v2455_v4, %v2392_v7  ;;  %v918_v54 = vrot.slane %v2455_v4, %v2389_v6  ;;  %v932_v62 = vrot.slane %v2455_v4, %v2469_v18  ;;  %v946_v63 = vrot.slane %v2455_v4, %v2486_v25 }
 0x283   : > { %v2019_v5 = vpop.eup %2018  ;;  %v939_v0 = vrot.slane %v2455_v4, %v2466_v56  ;;  %v960_v3 = vrot.slane %v2455_v4, %v2509_v42 }
 0x284   : > { %v480_v8 = vmul.f32 %v2019_v5, %v2368_v58  ;;  %v2549_v5 = vrot.slane %v880_v34, %v2442_v49  ;;  %v2006_v34 = vld [vmem:[#allocation5 + $0x78] sm:$0xff]  }
 0x286   : > { %v2021_v12 = vpop.eup %2020  ;;  %v1037_v13 = vrot.slane %v480_v8, %v2392_v7  ;;  %v1030_v14 = vrot.slane %v480_v8, %v2389_v6  ;;  %v1051_v58 = vrot.slane %v480_v8, %v2466_v56  ;;  %v1044_v19 = vrot.slane %v480_v8, %v2469_v18 }
 0x287   : > { %v2463_v15 = vmul.f32 %v2021_v12, %v2374_v61  ;;  %v2023_v17 = vpop.eup %2022  ;;  %v1065_v30 = vrot.slane %v480_v8, %v2483_v23  ;;  %v1058_v32 = vrot.slane %v480_v8, %v2486_v25  ;;  %v1072_v11 = vrot.slane %v480_v8, %v2509_v42 }
 0x288   : > { %1039 = vbcast.lane.b32.xlu1 %v1037_v13, 256  ;;  %1032 = vbcast.lane.b32.xlu0 %v1030_v14, 256  ;;  %v2477_v61 = vmul.f32 %v2023_v17, %v2370_v59  ;;  %v2494_v59 = vrot.slane %v681_v35, %v2442_v49  ;;  %v2506_v35 = vsub.s32 7, %v2383_v2  ;;  %v2520_v2 = vrot.slane %v697_v44, %v2442_v49  ;;  %v1998_v44 = vld [vmem:[#allocation5 + $0x58] sm:$0xff]  }
 0x289   : > { %1885 = vmatmul.mubr.msk.f32.vlgmr.msra.gmra.mrb[4].mxu0 %vm437_vm0, %v2463_v15  ;;  %v953_v12 = vrot.slane %v2455_v4, %v2483_v23  ;;  %v748_v17 = vcombine.high %v2420_v33, %v2429_v37  ;;  %v988_v24 = vrot.slane %v2463_v15, %v2469_v18  ;;  %v995_v47 = vrot.slane %v2463_v15, %v2466_v56 }
 0x28a   : > { %1887 = vmatprep.mubr.msk.f32.mxu0 %vm437_vm0, %v480_v8  ;;  %v1079_v9 = vrot.slane %v480_v8, %v2506_v35  ;;  %v747_v8 = vcombine.low %v2420_v33, %v2429_v37  ;;  %v1086_v13 = vrot.slane %v2477_v61, %v2389_v6  ;;  %v1093_v33 = vrot.slane %v2477_v61, %v2392_v7 }
 0x28b   : > { %v2567_v21 = vrot.slane %v748_v17, %v2442_v49  ;;  %v974_v37 = vrot.slane %v2463_v15, %v2389_v6  ;;  %v1107_v40 = vrot.slane %v2477_v61, %v2466_v56  ;;  %v2585_v6 = vrot.slane %v764_v38, %v2442_v49  ;;  %v2004_v56 = vld [vmem:[#allocation5 + $0x70] sm:$0xff]  }
 0x28c   : > { %1053 = vbcast.lane.b32.xlu1 %v1051_v58, 256  ;;  %1046 = vbcast.lane.b32.xlu0 %v1044_v19, 256  ;;  %v2558_v14 = vrot.slane %v747_v8, %v2442_v49  ;;  %v967_v58 = vrot.slane %v2455_v4, %v2506_v35  ;;  %v1100_v19 = vrot.slane %v2477_v61, %v2469_v18  ;;  %v1996_v4 = vld [vmem:[#allocation5 + $0x50] sm:$0xff]   ;;  %v2000_v18 = vld [vmem:[#allocation5 + $0x60] sm:$0xff]  }
 0x28d   : > { %1888 = vmatmul.mubr.msk.f32.gmra.mrb[6].mxu0 %vm437_vm0, %v2477_v61  ;;  %v1009_v57 = vrot.slane %v2463_v15, %v2483_v23 }
 0x290   : > { %1067 = vbcast.lane.b32.xlu1 %v1065_v30, 256  ;;  %1060 = vbcast.lane.b32.xlu0 %v1058_v32, 256  ;;  %v763_v30 = vcombine.low %v2432_v39, %v2436_v43  ;;  %v1995_v32 = vld [vmem:[#allocation5 + $0x8] sm:$0xff]   ;;  %v981_v39 = vrot.slane %v2463_v15, %v2392_v7  ;;  %v1002_v43 = vrot.slane %v2463_v15, %v2486_v25 }
 0x291   : > { %1837 = vmatpush3.bf16.msra.mxu1 %v1995_v32  ;;  %v1016_v7 = vrot.slane %v2463_v15, %v2509_v42 }
 0x292   : > { %v2576_v36 = vrot.slane %v763_v30, %v2442_v49  ;;  %1838 = vmatprep.subr.bf16.mxu1 %v1996_v4 }
 0x294   : > { %1081 = vbcast.lane.b32.xlu1 %v1079_v9, 256  ;;  %1074 = vbcast.lane.b32.xlu0 %v1072_v11, 256  ;;  %v895_v9 = vcombine.low %v2523_v50, %v2526_v51  ;;  %v1999_v11 = vld [vmem:[#allocation5 + $0x18] sm:$0xff]   ;;  %v1114_v50 = vrot.slane %v2477_v61, %v2486_v25  ;;  %v1023_v51 = vrot.slane %v2463_v15, %v2506_v35 }
 0x295   : > { %1839 = vmatpush3.bf16.msra.mxu1 %v1997_v29  ;;  %v1121_v25 = vrot.slane %v2477_v61, %v2483_v23  ;;  %v845_v15 = vcombine.high %v2449_v60, %v2160_v22 }
 0x296   : > { %1840 = vmatprep.subr.bf16.mxu1 %v1998_v44  ;;  %v2594_v45 = vrot.slane %v895_v9, %v2442_v49 }
 0x298   : > { %927 = vbcast.lane.b32.xlu1 %v925_v53, 256  ;;  %920 = vbcast.lane.b32.xlu0 %v918_v54, 256  ;;  %v2002_v53 = vld [vmem:[#allocation5 + $0x68] sm:$0xff]  }
 0x299   : > { %1841 = vmatpush3.bf16.msra.mxu1 %v1999_v11  ;;  %v2003_v54 = vld [vmem:[#allocation5 + $0x28] sm:$0xff]  }
 0x29a   : > { %1842 = vmatprep.subr.bf16.mxu1 %v2000_v18 }
 0x29c   : > { %934 = vbcast.lane.b32.xlu1 %v932_v62, 256  ;;  %948 = vbcast.lane.b32.xlu0 %v946_v63, 256  ;;  %v1128_v62 = vrot.slane %v2477_v61, %v2509_v42  ;;  %v2005_v63 = vld [vmem:[#allocation5 + $0x30] sm:$0xff]  }
 0x29d   : > { %1843 = vmatpush3.bf16.msra.mxu1 %v2001_v52 }
 0x29e   : > { %1844 = vmatprep.subr.bf16.mxu1 %v2002_v53 }
 0x2a0   : > { %941 = vbcast.lane.b32.xlu1 %v939_v0, 256  ;;  %962 = vbcast.lane.b32.xlu0 %v960_v3, 256  ;;  %v2007_v0 = vld [vmem:[#allocation5 + $0x38] sm:$0xff]   ;;  %v1135_v3 = vrot.slane %v2477_v61, %v2506_v35  ;;  %v847_v61 = vcombine.high %v2480_v20, %v2160_v22 }
 0x2a1   : > { %1845 = vmatpush3.bf16.msra.mxu1 %v2003_v54  ;;  %v714_v54 = vcombine.high %v2503_v41, %v2160_v22 }
 0x2a2   : > { %1846 = vmatprep.subr.bf16.mxu1 %v2004_v56 }
 0x2a4   : > { %955 = vbcast.lane.b32.xlu1 %v953_v12, 256  ;;  %1088 = vbcast.lane.b32.xlu0 %v1086_v13, 256  ;;  %v846_v12 = vcombine.high %v2452_v1, %v2160_v22 }
 0x2a5   : > { %1847 = vmatpush3.bf16.msra.mxu1 %v2005_v63 }
 0x2a6   : > { %1848 = vmatprep.subr.bf16.mxu1 %v2006_v34 }
 0x2a8   : > { %969 = vbcast.lane.b32.xlu1 %v967_v58, 256  ;;  %1102 = vbcast.lane.b32.xlu0 %v1100_v19, 256 }
 0x2a9   : > { %1849 = vmatpush3.bf16.msra.mxu1 %v2007_v0 }
 0x2ac   : > { %1095 = vbcast.lane.b32.xlu1 %v1093_v33, 256  ;;  %976 = vbcast.lane.b32.xlu0 %v974_v37, 256  ;;  %v848_v37 = vcombine.high %v2491_v26, %v2160_v22 }
 0x2b0   : > { %1109 = vbcast.lane.b32.xlu1 %v1107_v40, 256  ;;  %990 = vbcast.lane.b32.xlu0 %v988_v24, 256 }
 0x2b4   : > { %983 = vbcast.lane.b32.xlu1 %v981_v39, 256  ;;  %1004 = vbcast.lane.b32.xlu0 %v1002_v43, 256 }
 0x2b8   : > { %997 = vbcast.lane.b32.xlu1 %v995_v47, 256  ;;  %1018 = vbcast.lane.b32.xlu0 %v1016_v7, 256  ;;  %v713_v7 = vcombine.high %v2494_v59, %v2160_v22 }
 0x2bc   : > { %1011 = vbcast.lane.b32.xlu1 %v1009_v57, 256  ;;  %1116 = vbcast.lane.b32.xlu0 %v1114_v50, 256 }
 0x2c0   : > { %1025 = vbcast.lane.b32.xlu1 %v1023_v51, 256  ;;  %1130 = vbcast.lane.b32.xlu0 %v1128_v62, 256 }
 0x2c4   : > { %1123 = vbcast.lane.b32.xlu1 %v1121_v25, 256 }
 0x2c8   : > { %1137 = vbcast.lane.b32.xlu1 %v1135_v3, 256 }
 0x2fa   : > { %v1040_v42 = vpop.permute.xlu1 %1039  ;;  %v1033_v8 = vpop.permute.xlu0 %1032 }
 0x2fb   : > { %v1156_v10 = vmul.f32 %v1040_v42, %v845_v15  ;;  %v1155_v23 = vmul.f32 %v1033_v8, %v2449_v60  ;;  %v715_v42 = vcombine.high %v2520_v2, %v2160_v22 }
 0x2fe   : > { %v1054_v13 = vpop.permute.xlu1 %1053  ;;  %v1047_v17 = vpop.permute.xlu0 %1046 }
 0x2ff   : > { %v1158_v58 = vmul.f32 %v1054_v13, %v846_v12  ;;  %v1157_v19 = vmul.f32 %v1047_v17, %v2452_v1  ;;  %v716_v17 = vcombine.high %v2535_v55, %v2160_v22 }
 0x301   : > { %v1279_v27 = vcombine.low %v1156_v10, %v1158_v58  ;;  %v1271_v28 = vcombine.low %v1155_v23, %v1157_v19 }
 0x302   : > { %v1068_v35 = vpop.permute.xlu1 %1067  ;;  %v1061_v30 = vpop.permute.xlu0 %1060 }
 0x303   : > { %v1286_v32 = vrot.slane %v1279_v27, %v2403_v16  ;;  %v1278_v33 = vrot.slane %v1271_v28, %v2403_v16  ;;  %v1160_v38 = vmul.f32 %v1068_v35, %v847_v61  ;;  %v1159_v1 = vmul.f32 %v1061_v30, %v2480_v20 }
 0x305   : > { %v1303_v4 = vcombine.low %v1278_v33, %v1286_v32  ;;  %v911_v33 = vcombine.high %v2542_v31, %v2160_v22 }
 0x306   : > { %v1082_v60 = vpop.permute.xlu1 %1081  ;;  %v1075_v40 = vpop.permute.xlu0 %1074 }
 0x307   : > { %v1162_v24 = vmul.f32 %v1082_v60, %v848_v37  ;;  %v1161_v29 = vmul.f32 %v1075_v40, %v2491_v26  ;;  %v2632_v44 = vrot.slane %v1303_v4, %v2442_v49  ;;  %v912_v60 = vcombine.high %v2549_v5, %v2160_v22 }
 0x309   : > { %v1295_v9 = vcombine.low %v1160_v38, %v1162_v24  ;;  %v1287_v11 = vcombine.low %v1159_v1, %v1161_v29 }
 0x30a   : > { %v928_v39 = vpop.permute.xlu1 %927  ;;  %v921_v43 = vpop.permute.xlu0 %920 }
 0x30b   : > { %v1302_v18 = vrot.slane %v1295_v9, %v2403_v16  ;;  %v1294_v46 = vrot.slane %v1287_v11, %v2403_v16  ;;  %v1139_v53 = vmul.f32 %v921_v43, %v2494_v59  ;;  %v1140_v62 = vmul.f32 %v928_v39, %v713_v7 }
 0x30d   : > { %v1311_v47 = vcombine.low %v1294_v46, %v1302_v18 }
 0x30e   : > { %v935_v52 = vpop.permute.xlu1 %934  ;;  %v949_v20 = vpop.permute.xlu0 %948 }
 0x30f   : > { %v1141_v26 = vmul.f32 %v935_v52, %v2503_v41  ;;  %v2643_v57 = vrot.slane %v1311_v47, %v2442_v49  ;;  %v1143_v0 = vmul.f32 %v949_v20, %v2520_v2 }
 0x311   : > { %v1171_v50 = vcombine.low %v1139_v53, %v1141_v26  ;;  %v1320_v56 = vcombine.high %v2632_v44, %v2643_v57  ;;  %v1319_v51 = vcombine.low %v2632_v44, %v2643_v57  ;;  %v780_v26 = vcombine.high %v2567_v21, %v2160_v22 }
 0x312   : > { %v942_v63 = vpop.permute.xlu1 %941  ;;  %v963_v34 = vpop.permute.xlu0 %962 }
 0x313   : > { %v1178_v59 = vrot.slane %v1171_v50, %v2403_v16  ;;  %v1142_v25 = vmul.f32 %v942_v63, %v714_v54  ;;  %v1145_v41 = vmul.f32 %v963_v34, %v2535_v55 }
 0x315   : > { %v1179_v3 = vcombine.low %v1140_v62, %v1142_v25  ;;  %v1187_v15 = vcombine.low %v1143_v0, %v1145_v41 }
 0x316   : > { %v956_v8 = vpop.permute.xlu1 %955  ;;  %v1089_v10 = vpop.permute.xlu0 %1088 }
 0x317   : > { %v1186_v12 = vrot.slane %v1179_v3, %v2403_v16  ;;  %v1194_v13 = vrot.slane %v1187_v15, %v2403_v16  ;;  %v1144_v58 = vmul.f32 %v956_v8, %v715_v42  ;;  %v1163_v28 = vmul.f32 %v1089_v10, %v2542_v31 }
 0x318   : > { %v781_v3 = vcombine.high %v2576_v36, %v2160_v22 }
 0x319   : > { %v1203_v23 = vcombine.low %v1178_v59, %v1186_v12  ;;  %v782_v12 = vcombine.high %v2585_v6, %v2160_v22 }
 0x31a   : > { %v970_v19 = vpop.permute.xlu1 %969  ;;  %v1103_v27 = vpop.permute.xlu0 %1102 }
 0x31b   : > { %v1146_v61 = vmul.f32 %v970_v19, %v716_v17  ;;  %v1165_v35 = vmul.f32 %v1103_v27, %v2549_v5  ;;  %v2661_v2 = vrot.slane %v1203_v23, %v2442_v49  ;;  %v779_v5 = vcombine.high %v2558_v14, %v2160_v22 }
 0x31d   : > { %v1195_v30 = vcombine.low %v1144_v58, %v1146_v61  ;;  %v1321_v32 = vcombine.low %v1163_v28, %v1165_v35 }
 0x31e   : > { %v1096_v37 = vpop.permute.xlu1 %1095  ;;  %v977_v4 = vpop.permute.xlu0 %976 }
 0x31f   : > { %v1202_v55 = vrot.slane %v1195_v30, %v2403_v16  ;;  %v1328_v38 = vrot.slane %v1321_v32, %v2403_v16  ;;  %v1164_v1 = vmul.f32 %v1096_v37, %v911_v33  ;;  %v1147_v9 = vmul.f32 %v977_v4, %v2558_v14 }
 0x320   : > { %v914_v33 = vcombine.high %v2603_v48, %v2160_v22 }
 0x321   : > { %v1211_v40 = vcombine.low %v1194_v13, %v1202_v55 }
 0x322   : > { %v1110_v24 = vpop.permute.xlu1 %1109  ;;  %v991_v29 = vpop.permute.xlu0 %990 }
 0x323   : > { %v1166_v11 = vmul.f32 %v1110_v24, %v912_v60  ;;  %v1149_v39 = vmul.f32 %v991_v29, %v2567_v21  ;;  %v1218_v31 = vrot.slane %v1211_v40, %v2442_v49 }
 0x325   : > { %v1329_v43 = vcombine.low %v1164_v1, %v1166_v11  ;;  %v1221_v18 = vcombine.low %v1147_v9, %v1149_v39  ;;  %v1219_v46 = vcombine.low %v2661_v2, %v1218_v31  ;;  %v1220_v47 = vcombine.high %v2661_v2, %v1218_v31 }
 0x326   : > { %v984_v7 = vpop.permute.xlu1 %983  ;;  %v1005_v52 = vpop.permute.xlu0 %1004 }
 0x327   : > { %v1336_v20 = vrot.slane %v1329_v43, %v2403_v16  ;;  %v1228_v53 = vrot.slane %v1221_v18, %v2403_v16  ;;  %v1148_v50 = vmul.f32 %v984_v7, %v779_v5  ;;  %v1151_v34 = vmul.f32 %v1005_v52, %v2576_v36 }
 0x329   : > { %v1353_v54 = vcombine.low %v1328_v38, %v1336_v20 }
 0x32a   : > { %v998_v62 = vpop.permute.xlu1 %997  ;;  %v1019_v63 = vpop.permute.xlu0 %1018 }
 0x32b   : > { %v1150_v59 = vmul.f32 %v998_v62, %v780_v26  ;;  %v1153_v0 = vmul.f32 %v1019_v63, %v2585_v6  ;;  %v1360_v14 = vrot.slane %v1353_v54, %v2442_v49  ;;  %v913_v6 = vcombine.high %v2594_v45, %v2160_v22 }
 0x32d   : > { %v1229_v25 = vcombine.low %v1148_v50, %v1150_v59  ;;  %v1237_v41 = vcombine.low %v1151_v34, %v1153_v0 }
 0x32e   : > { %v1012_v15 = vpop.permute.xlu1 %1011  ;;  %v1117_v42 = vpop.permute.xlu0 %1116 }
 0x32f   : > { %v1236_v21 = vrot.slane %v1229_v25, %v2403_v16  ;;  %v1244_v8 = vrot.slane %v1237_v41, %v2403_v16  ;;  %v1152_v13 = vmul.f32 %v1012_v15, %v781_v3  ;;  %v1167_v58 = vmul.f32 %v1117_v42, %v2594_v45 }
 0x331   : > { %v1253_v10 = vcombine.low %v1228_v53, %v1236_v21 }
 0x332   : > { %v1026_v17 = vpop.permute.xlu1 %1025  ;;  %v1131_v23 = vpop.permute.xlu0 %1130 }
 0x333   : > { %v1154_v19 = vmul.f32 %v1026_v17, %v782_v12  ;;  %v1169_v27 = vmul.f32 %v1131_v23, %v2603_v48  ;;  %v1260_v36 = vrot.slane %v1253_v10, %v2442_v49 }
 0x335   : > { %v1245_v28 = vcombine.low %v1152_v13, %v1154_v19  ;;  %v1337_v61 = vcombine.low %v1167_v58, %v1169_v27 }
 0x336   : > { %v1124_v35 = vpop.permute.xlu1 %1123 }
 0x337   : > { %v1252_v2 = vrot.slane %v1245_v28, %v2403_v16  ;;  %v1344_v30 = vrot.slane %v1337_v61, %v2403_v16  ;;  %v1168_v4 = vmul.f32 %v1124_v35, %v913_v6 }
 0x339   : > { %v1261_v32 = vcombine.low %v1244_v8, %v1252_v2 }
 0x33a   : > { %v1138_v37 = vpop.permute.xlu1 %1137 }
 0x33b   : > { %v1170_v55 = vmul.f32 %v1138_v37, %v914_v33  ;;  %v1268_v38 = vrot.slane %v1261_v32, %v2442_v49 }
 0x33d   : > { %v1345_v60 = vcombine.low %v1168_v4, %v1170_v55  ;;  %v1269_v40 = vcombine.low %v1260_v36, %v1268_v38  ;;  %v1270_v1 = vcombine.high %v1260_v36, %v1268_v38 }
 0x33f   : > { %v1352_v24 = vrot.slane %v1345_v60, %v2403_v16  ;;  %v1372_v29 = vpack.c.bf16 %v1270_v1, %v1220_v47  ;;  %v1371_v9 = vpack.c.bf16 %v1269_v40, %v1219_v46 }
 0x341   : > { %v1361_v11 = vcombine.low %v1344_v30, %v1352_v24  ;;  %1637 = vmatprep.mubr.bf16.mxu1 %v1372_v29 }
 0x342   : > { %1638 = vmatmul.mubr.bf16.vlgmr.msra.gmra.mrb[8].mxu1 %v1371_v9 }
 0x343   : > { %v1368_v45 = vrot.slane %v1361_v11, %v2442_v49 }
 0x345   : > { %v1370_v39 = vcombine.high %v1360_v14, %v1368_v45  ;;  %v1369_v22 = vcombine.low %v1360_v14, %v1368_v45 }
 0x347   : > { %v1374_v48 = vpack.c.bf16 %v1370_v39, %v1320_v56  ;;  %v1373_v31 = vpack.c.bf16 %v1369_v22, %v1319_v51 }
 0x349   : > { %1645 = vmatprep.mubr.bf16.mxu1 %v1374_v48 }
 0x34a   : > { %1646 = vmatmul.mubr.bf16.gmra.mrb[12].mxu1 %v1373_v31 }
 0x35c   : > { %v1886_v16 = vpop.f32.mrb[4].mxu0 }
 0x35d   : > { %v1490_v43 = vpop.f32.mrb[5].mxu0 }
 0x360   : > { %v1889_v18 = vpop.f32.mrb[6].mxu0 }
 0x361   : > { %v1500_v46 = vpop.f32.mrb[7].mxu0 }
 0x415   : > { %v1850_v47 = vpop.f32.mrb[8].mxu1 }
 0x416   : > { %v1851_v49 = vpop.f32.mrb[9].mxu1 }
 0x417   : > { %v1852_v5 = vadd.f32 %v1851_v49, %v1850_v47  ;;  %v1853_v7 = vpop.f32.mrb[10].mxu1 }
 0x418   : > { %v1854_v52 = vpop.f32.mrb[11].mxu1 }
 0x419   : > { %v1640_v20 = vadd.f32 %v1852_v5, %v1490_v43  ;;  %v1855_v56 = vadd.f32 %v1854_v52, %v1853_v7 }
 0x41b   : > { %1654 = vst [vmem:[%s302_s19] sm:$0xff] %v1640_v20  ;;  %v1643_v44 = vadd.f32 %v1886_v16, %v1855_v56 }
 0x41d   : > { %1655 = vst [vmem:[%s302_s19 + $0x8] sm:$0xff] %v1643_v44  ;;  %v1856_v57 = vpop.f32.mrb[12].mxu1 }
 0x41e   : > { %v1857_v51 = vpop.f32.mrb[13].mxu1 }
 0x41f   : > { %v1858_v53 = vadd.f32 %v1857_v51, %v1856_v57  ;;  %v1859_v26 = vpop.f32.mrb[14].mxu1 }
 0x420   : > { %v1860_v54 = vpop.f32.mrb[15].mxu1 }
 0x421   : > { %v1648_v50 = vadd.f32 %v1858_v53, %v1500_v46  ;;  %v1861_v62 = vadd.f32 %v1860_v54, %v1859_v26 }
 0x423   : > { %1656 = vst [vmem:[%s302_s19 + $0x10] sm:$0xff] %v1648_v50  ;;  %v1651_v63 = vadd.f32 %v1889_v18, %v1861_v62 }
 0x425   : > { %1657 = vst [vmem:[%s302_s19 + $0x18] sm:$0xff] %v1651_v63 }
 0x426   : > { %2093 = shalt.err (!%p2090_p11)
}
 0x427   : > { %s2094_s9 = scalar_lea.hbm %s2714_s21, 512  ;;  %s2098_s14 = scalar_lea.hbm %s2764_s7, 1024 }
 0x428   : > { %p2095_p13 = scmp.ne.s32.totalorder %s2714_s21, %s2094_s9  ;;  %p2099_p6 = scmp.lt.u32.totalorder %s2714_s21, %s2764_s7 }
 0x429   : > { %p2100_p9 = scmp.lt.u32.totalorder %s2098_s14, %s2094_s9  ;;  %p2102_p12 = scmp.lt.u32.totalorder %s2094_s9, %s2714_s21 }
 0x42a   : > { %p2096_p0 = pnand %p2095_p13, %p2778_p1 }
 0x42b   : > { %p2101_p10 = por %p2100_p9, %p2099_p6 }
 0x42c   : > { %p2097_p5 = pneg %p2096_p0 }
 0x42d   : > { %p2103_p2 = por %p2102_p12, %p2101_p10 }
 0x42f   : > { %p2104_p3 = pnand %p2103_p2, %p2097_p5 }
 0x431   : > { %2107 = shalt.err (!%p2104_p3)
}
 0x432   : > { %s2163_s18 = smov 128   ;;  %s2164_s20 = smov 8  }
 0x433   : > { %1898 = dma.vmem_to_hbm [thread:$0]  (%p2778_p1), %s2709_s16, 512, %s2714_s21, %s2716_s22, %s2163_s18, %s2163_s18, %s2164_s20  }
 0x434 PF: > { %p1915_p4 = scmp.ge.s32.totalorder %s2150_s27, 2  ;;  %s1687_s13 = sand.u32 1, %s2138_s24  }
 0x435   : > { %p2779_p7 = scmp.ne.s32.totalorder %s2770_s12, 0  ;;  %s1688_s23 = scalar_lea.sflag [#allocation4], %s1687_s13 }
 0x437   : > { %p1908_p8 = pnand %p1915_p4, %p2779_p7 }
 0x439   : > { %2133 = dma.done.wait (!%p1908_p8), %s1688_s23, 512  }
 0x43a   : > { %2135 = vsyncadd (!%p1908_p8), %s1688_s23, 4294966784  ;;  %s2780_s28 = sld [smem:[#allocation11_spill]]  ;;  %p19_p11 = scmp.ge.s32.totalorder %s2230_s30, 4  }
 0x43b   : > { %s2781_s24 = smov %s2142_s25  ;;  %s2782_s25 = smov %s2146_s26 }
 0x43c   : > { %s2784_s27 = smov %s2230_s30  ;;  %21 = sbr.rel (!%p19_p11) target bundleno = 5 (0x5), region = 92 }
 0x440   : > { %s2783_s26 = smov %s2780_s28 }
 0x443   :  { %1693 = vsyncpa [#allocation3], 1 }
 0x444   :  { %1695 = vsyncpa [#allocation3 + $0x1], 1 }
 0x445   :  { %1696 = vsyncpa [#allocation6], 1 }
 0x446   :  { %1697 = vsyncpa [#allocation4], 1 }
 0x447   :  { %1699 = vsyncpa [#allocation4 + $0x1], 1 }

</bundles_post_ra>
